<compile_context>
chip_gen: v5e
topology: v5e:2x2
jax: 0.10.0
libtpu: 0.0.40
codegen_flags: <defaults>
</compile_context>

<pallas_src>
import functools

import jax
import jax.numpy as jnp
from jax import lax
from jax.experimental import pallas as pl
from jax.experimental.pallas import tpu as pltpu


def _round_up(x, m):
    return (x + m - 1) // m * m


def _vmem_limit_bytes():
    """Generation-aware scoped-VMEM request: 3/4 of physical, capped at 96 MiB."""
    try:
        cap = int(pltpu.get_tpu_info().vmem_capacity_bytes)
    except Exception:
        cap = 64 * 1024 * 1024          # conservative fallback (= v7x physical)
    return int(min((cap * 3) // 4, 96 * 1024 * 1024))


def _auto_tile_rows(n, c, logits_dtype, vmem_limit):
    """Pick tile_n from the VMEM budget (double-buffered, lane-padded blocks)."""
    itemsize = jnp.dtype(logits_dtype).itemsize
    sub = max(8, 32 // itemsize)                    # 8 f32 / 16 bf16 / 32 int8
    # Lane-padded VMEM bytes per row for each streamed block:
    row_logits = _round_up(c, 128) * itemsize       # (tile_n, C) logits block
    row_side = 2 * 128 * 4                          # (tile_n, 1) targets + alpha
    per_row = 2 * (row_logits + row_side)           # x2 for double buffering
    tile = (vmem_limit * 3 // 4) // per_row
    # Keep a single logits block at <= ~8 MiB so there is always headroom.
    tile = min(tile, (8 * 1024 * 1024) // max(1, row_logits), 32768)
    tile = min(tile, _round_up(n, sub))             # never bigger than the problem
    tile = max(sub, (tile // sub) * sub)
    return int(tile), int(sub)


def _focal_loss_kernel(logits_ref, targets_ref, alpha_ref, out_ref, acc_ref, *,
                       gamma, n_valid, tile_n, tiles_per_core):
    p = pl.program_id(0)                  # TensorCore split ("parallel")
    i = pl.program_id(1)                  # row-tile sweep  ("arbitrary")

    # Zero this core's accumulator at the start of its sweep.
    @pl.when(i == 0)
    def _():
        acc_ref[...] = jnp.zeros_like(acc_ref)

    logits = logits_ref[...].astype(jnp.float32)      # (tile_n, C)
    tgt = targets_ref[...]                            # (tile_n, 1) int32
    alpha_n = alpha_ref[...].astype(jnp.float32)      # (tile_n, 1) f32

    tn, c = logits.shape
    col = lax.broadcasted_iota(jnp.int32, (tn, c), 1)
    is_tgt = col == tgt                               # one-hot (scatter_) mask

    # Numerically stable log-softmax gather of the target class.
    m = jnp.max(logits, axis=1, keepdims=True)                    # (tile_n, 1)
    s = jnp.sum(jnp.exp(logits - m), axis=1, keepdims=True)       # (tile_n, 1)
    x_t = jnp.sum(jnp.where(is_tgt, logits, 0.0), axis=1, keepdims=True)
    log_p = (x_t - m) - jnp.log(s)                                # (tile_n, 1)
    probs = jnp.exp(log_p)

    one_minus_p = 1.0 - probs
    if float(gamma) == int(gamma):
        focal = lax.integer_pow(one_minus_p, int(gamma))   # gamma=2 fast path
    else:
        focal = jnp.power(one_minus_p, gamma)              # non-integer fallback

    batch_loss = -alpha_n * focal * log_p                  # (tile_n, 1)

    # Mask rows past the true batch size.  jnp.where (not a multiply) so that
    # garbage/NaN in the unpadded tail of a partial block is dropped cleanly.
    row = (lax.broadcasted_iota(jnp.int32, (tn, 1), 0)
           + (p * tiles_per_core + i) * tile_n)
    batch_loss = jnp.where(row < n_valid, batch_loss, 0.0)

    acc_ref[...] += jnp.sum(batch_loss, keepdims=True)     # (1, 1)

    # Write this core's partial once, at the end of its sweep.
    @pl.when(i == pl.num_programs(1) - 1)
    def _():
        out_ref[...] = jnp.broadcast_to(acc_ref[...], out_ref.shape)


def focal_loss(logits, targets, alpha=None, gamma=2, size_average=True,
               tile_n=None):
    """Focal loss forward pass on TPU via Pallas.

    logits:  (N, C) float (f32 or bf16; kept in its HBM dtype, upcast in-kernel)
    targets: (N,)   int class ids in [0, C)
    alpha:   (C,) or (C, 1) per-class weights; defaults to ones (module default)
    returns: scalar float32 loss
    """
    n, c = logits.shape
    if alpha is None:
        alpha = jnp.ones((c,), dtype=jnp.float32)
    alpha_flat = jnp.reshape(jnp.asarray(alpha, dtype=jnp.float32), (-1,))
    targets_i32 = targets.astype(jnp.int32)
    # Per-sample alpha gathered once here (tiny N-element gather) so the kernel
    # does not need a second cross-lane reduction per tile.
    alpha_col = jnp.reshape(jnp.take(alpha_flat, targets_i32, axis=0), (n, 1))
    targets_col = jnp.reshape(targets_i32, (n, 1))

    vmem_limit = _vmem_limit_bytes()
    auto_tile, sub = _auto_tile_rows(n, c, logits.dtype, vmem_limit)
    if tile_n is None:
        tile_n = auto_tile
    tile_n = max(sub, _round_up(int(tile_n), sub))

    # No jnp.pad of the inputs: the grid covers ceil(N / tile_n) tiles and the
    # kernel masks the tail rows of the last (partial) block.
    num_tiles = int(pl.cdiv(n, tile_n))
    num_splits = 2 if num_tiles >= 2 else 1      # split reduction over both TCs (v7x)
    tiles_per_core = int(pl.cdiv(num_tiles, num_splits))

    # TODO(synk): for C < 128, lane-pack k = 128 // C rows per 128-lane row
    # (dense DMA, 8x smaller VMEM blocks); needs in-kernel segment max/sum.

    def row_block(pcore, i):
        # Clamp so an odd tile count never produces an out-of-range block DMA;
        # the duplicated (clamped) block is fully masked by the row check.
        t = jnp.minimum(pcore * tiles_per_core + i, num_tiles - 1)
        return (t, 0)

    kernel = functools.partial(
        _focal_loss_kernel,
        gamma=float(gamma),
        # TODO(synk): pass n_valid via scalar prefetch (SMEM) to avoid a
        # retrace/recompile per distinct batch size in serving workloads.
        n_valid=int(n),
        tile_n=int(tile_n),
        tiles_per_core=tiles_per_core,
    )

    out = pl.pallas_call(
        kernel,
        out_shape=jax.ShapeDtypeStruct((num_splits * 8, 128), jnp.float32),
        grid_spec=pltpu.PrefetchScalarGridSpec(
            num_scalar_prefetch=0,
            grid=(num_splits, tiles_per_core),
            in_specs=[
                pl.BlockSpec((tile_n, c), row_block),   # logits tile
                pl.BlockSpec((tile_n, 1), row_block),   # targets tile
                pl.BlockSpec((tile_n, 1), row_block),   # alpha[targets] tile
            ],
            out_specs=pl.BlockSpec((8, 128), lambda pcore, i: (pcore, 0)),
            scratch_shapes=[pltpu.VMEM((1, 1), jnp.float32)],   # per-core sum
        ),
        compiler_params=pltpu.CompilerParams(
            dimension_semantics=("parallel", "arbitrary"),
            vmem_limit_bytes=int(vmem_limit),
        ),
    )(logits, targets_col, alpha_col)

    # One partial per core (broadcast over its (8,128) block); combine here.
    total = jnp.sum(out[0::8, 0])
    if size_average:
        total = total / jnp.float32(n)
    return total


def _focal_loss_ref(logits, targets, alpha, gamma=2, size_average=True):
    logits = logits.astype(jnp.float32)
    log_probs = jax.nn.log_softmax(logits, axis=1)
    log_p = jnp.take_along_axis(log_probs, targets[:, None], axis=1)  # (N, 1)
    probs = jnp.exp(log_p)
    alpha_n = alpha[targets][:, None]
    batch_loss = -alpha_n * (1.0 - probs) ** gamma * log_p
    return jnp.mean(batch_loss) if size_average else jnp.sum(batch_loss)


if __name__ == "__main__":
    key = jax.random.PRNGKey(0)
    k1, k2, k3 = jax.random.split(key, 3)

    # Case 1: shapes matching the module defaults (batch=8, class_num=16).
    N, C = 8, 16
    logits = jax.random.normal(k1, (N, C), dtype=jnp.float32)
    targets = jax.random.randint(k2, (N,), 0, C, dtype=jnp.int32)

    loss = focal_loss(logits, targets, gamma=2, size_average=True)
    loss = jax.block_until_ready(loss)
    ref = _focal_loss_ref(logits, targets, jnp.ones((C,), jnp.float32), 2, True)
    assert jnp.allclose(loss, ref, rtol=1e-5, atol=1e-5), (loss, ref)

    # Case 2: N not a multiple of the tile, dual-core split + clamped last tile,
    # per-class alpha, sum reduction.
    N2, C2 = 40, 16
    logits2 = jax.random.normal(k3, (N2, C2), dtype=jnp.float32)
    targets2 = jax.random.randint(k2, (N2,), 0, C2, dtype=jnp.int32)
    per_cls = jnp.linspace(0.5, 1.5, C2, dtype=jnp.float32)

    loss2 = focal_loss(logits2, targets2, alpha=per_cls, gamma=2,
                       size_average=False, tile_n=16)
    loss2 = jax.block_until_ready(loss2)
    ref2 = _focal_loss_ref(logits2, targets2, per_cls, 2, False)
    assert jnp.allclose(loss2, ref2, rtol=1e-5, atol=1e-5), (loss2, ref2)

    print("KERNEL_OK")
</pallas_src>

<mosaic_0001>
module attributes {stable_mosaic.version = 11 : i64} {
  func.func @_focal_loss_kernel(%arg0: i32, %arg1: i32, %arg2: memref<8x16xf32, #tpu.memory_space<vmem>>, %arg3: memref<8x1xi32, #tpu.memory_space<vmem>>, %arg4: memref<8x1xf32, #tpu.memory_space<vmem>>, %arg5: memref<8x128xf32, #tpu.memory_space<vmem>>, %arg6: memref<1x1xf32, #tpu.memory_space<vmem>>) attributes {dimension_semantics = [#tpu.dimension_semantics<parallel>, #tpu.dimension_semantics<arbitrary>], iteration_bounds = array<i64: 1, 1>, scalar_prefetch = 0 : i64, scratch_operands = 1 : i64, tpu.core_type = #tpu.core_type<tc>, window_params = [{transform_indices = @transform_0, window_bounds = array<i64: 8, 16>}, {transform_indices = @transform_1, window_bounds = array<i64: 8, 1>}, {transform_indices = @transform_2, window_bounds = array<i64: 8, 1>}, {transform_indices = @transform_3, window_bounds = array<i64: 8, 128>}]} {
    %c0_i32 = arith.constant 0 : i32
    %0 = arith.cmpi eq, %arg1, %c0_i32 : i32
    %1 = arith.extui %0 : i1 to i32
    %c0_i32_0 = arith.constant 0 : i32
    %2 = arith.cmpi ne, %1, %c0_i32_0 : i32
    scf.if %2 {
      %cst_20 = arith.constant 0.000000e+00 : f32
      %52 = vector.broadcast %cst_20 : f32 to vector<1x1xf32>
      %c0_21 = arith.constant 0 : index
      %c0_22 = arith.constant 0 : index
      %53 = vector.load %arg6[%c0_21, %c0_22] : memref<1x1xf32, #tpu.memory_space<vmem>>, vector<1x1xf32>
      tpu.vector_store %arg6[%c0_21, %c0_22], %52 {strides = array<i32>} : memref<1x1xf32, #tpu.memory_space<vmem>>, vector<1x1xf32>,
    } else {
    }
    %c0 = arith.constant 0 : index
    %c0_1 = arith.constant 0 : index
    %3 = vector.load %arg2[%c0, %c0_1] : memref<8x16xf32, #tpu.memory_space<vmem>>, vector<8x16xf32>
    %c0_2 = arith.constant 0 : index
    %c0_3 = arith.constant 0 : index
    %4 = vector.load %arg3[%c0_2, %c0_3] : memref<8x1xi32, #tpu.memory_space<vmem>>, vector<8x1xi32>
    %c0_4 = arith.constant 0 : index
    %c0_5 = arith.constant 0 : index
    %5 = vector.load %arg4[%c0_4, %c0_5] : memref<8x1xf32, #tpu.memory_space<vmem>>, vector<8x1xf32>
    %6 = tpu.iota {dimensions = array<i32: 1>} : vector<8x16xi32>
    %7 = vector.broadcast %4 : vector<8x1xi32> to vector<8x16xi32>
    %8 = arith.cmpi eq, %6, %7 : vector<8x16xi32>
    %cst = arith.constant dense<0xFF800000> : vector<8xf32>
    %9 = vector.multi_reduction <maximumf>, %3, %cst [1] : vector<8x16xf32> to vector<8xf32>
    %10 = vector.shape_cast %9 : vector<8xf32> to vector<8x1xf32>
    %11 = vector.broadcast %10 : vector<8x1xf32> to vector<8x16xf32>
    %12 = arith.subf %3, %11 : vector<8x16xf32>
    %13 = math.exp %12 : vector<8x16xf32>
    %cst_6 = arith.constant dense<0.000000e+00> : vector<8xf32>
    %14 = vector.multi_reduction <add>, %13, %cst_6 [1] : vector<8x16xf32> to vector<8xf32>
    %15 = vector.shape_cast %14 : vector<8xf32> to vector<8x1xf32>
    %cst_7 = arith.constant 0.000000e+00 : f32
    %16 = vector.broadcast %cst_7 : f32 to vector<8x16xf32>
    %17 = arith.select %8, %3, %16 : vector<8x16xi1>, vector<8x16xf32>
    %cst_8 = arith.constant dense<0.000000e+00> : vector<8xf32>
    %18 = vector.multi_reduction <add>, %17, %cst_8 [1] : vector<8x16xf32> to vector<8xf32>
    %19 = vector.shape_cast %18 : vector<8xf32> to vector<8x1xf32>
    %20 = arith.subf %19, %10 : vector<8x1xf32>
    %21 = math.log %15 : vector<8x1xf32>
    %22 = arith.subf %20, %21 : vector<8x1xf32>
    %23 = math.exp %22 : vector<8x1xf32>
    %cst_9 = arith.constant 1.000000e+00 : f32
    %24 = vector.broadcast %cst_9 : f32 to vector<8x1xf32>
    %25 = arith.subf %24, %23 : vector<8x1xf32>
    %26 = arith.mulf %25, %25 : vector<8x1xf32>
    %cst_10 = arith.constant 0.000000e+00 : f32
    %27 = vector.broadcast %cst_10 : f32 to vector<8x1xf32>
    %28 = arith.subf %27, %5 : vector<8x1xf32>
    %29 = arith.mulf %28, %26 : vector<8x1xf32>
    %30 = arith.mulf %29, %22 : vector<8x1xf32>
    %31 = tpu.iota {dimensions = array<i32: 0>} : vector<8x1xi32>
    %c1_i32 = arith.constant 1 : i32
    %32 = arith.muli %arg0, %c1_i32 : i32
    %33 = arith.addi %32, %arg1 : i32
    %c8_i32 = arith.constant 8 : i32
    %34 = arith.muli %33, %c8_i32 : i32
    %35 = vector.broadcast %34 : i32 to vector<8x1xi32>
    %36 = arith.addi %31, %35 : vector<8x1xi32>
    %c8_i32_11 = arith.constant 8 : i32
    %37 = vector.broadcast %c8_i32_11 : i32 to vector<8x1xi32>
    %38 = arith.cmpi slt, %36, %37 : vector<8x1xi32>
    %cst_12 = arith.constant 0.000000e+00 : f32
    %39 = vector.broadcast %cst_12 : f32 to vector<8x1xf32>
    %40 = arith.select %38, %30, %39 : vector<8x1xi1>, vector<8x1xf32>
    %c0_13 = arith.constant 0 : index
    %c0_14 = arith.constant 0 : index
    %41 = vector.load %arg6[%c0_13, %c0_14] : memref<1x1xf32, #tpu.memory_space<vmem>>, vector<1x1xf32>
    %42 = vector.shape_cast %40 : vector<8x1xf32> to vector<1x8x1xf32>
    %cst_15 = arith.constant dense<0.000000e+00> : vector<1xf32>
    %43 = vector.multi_reduction <add>, %42, %cst_15 [1, 2] : vector<1x8x1xf32> to vector<1xf32>
    %44 = vector.shape_cast %43 : vector<1xf32> to vector<1x1x1xf32>
    %45 = vector.extract %44[0, 0, 0] : f32 from vector<1x1x1xf32>
    %46 = vector.broadcast %45 : f32 to vector<1x1xf32>
    %47 = arith.addf %41, %46 : vector<1x1xf32>
    %c0_16 = arith.constant 0 : index
    %c0_17 = arith.constant 0 : index
    %48 = vector.load %arg6[%c0_16, %c0_17] : memref<1x1xf32, #tpu.memory_space<vmem>>, vector<1x1xf32>
    tpu.vector_store %arg6[%c0_16, %c0_17], %47 {strides = array<i32>} : memref<1x1xf32, #tpu.memory_space<vmem>>, vector<1x1xf32>,
    %c0_i32_18 = arith.constant 0 : i32
    %49 = arith.cmpi eq, %arg1, %c0_i32_18 : i32
    %50 = arith.extui %49 : i1 to i32
    %c0_i32_19 = arith.constant 0 : i32
    %51 = arith.cmpi ne, %50, %c0_i32_19 : i32
    scf.if %51 {
      %c0_20 = arith.constant 0 : index
      %c0_21 = arith.constant 0 : index
      %52 = vector.load %arg6[%c0_20, %c0_21] : memref<1x1xf32, #tpu.memory_space<vmem>>, vector<1x1xf32>
      %53 = vector.shape_cast %52 : vector<1x1xf32> to vector<1x1xf32>
      %54 = vector.broadcast %53 : vector<1x1xf32> to vector<8x128xf32>
      %c0_22 = arith.constant 0 : index
      %c0_23 = arith.constant 0 : index
      %55 = vector.load %arg5[%c0_22, %c0_23] : memref<8x128xf32, #tpu.memory_space<vmem>>, vector<8x128xf32>
      tpu.vector_store %arg5[%c0_22, %c0_23], %54 {strides = array<i32>} : memref<8x128xf32, #tpu.memory_space<vmem>>, vector<8x128xf32>,
    } else {
    }
    return
  }
  func.func @transform_0(%arg0: i32, %arg1: i32) -> (i32, i32) {
    %c1_i32 = arith.constant 1 : i32
    %0 = arith.muli %arg0, %c1_i32 : i32
    %1 = arith.addi %0, %arg1 : i32
    %c0_i32 = arith.constant 0 : i32
    %2 = arith.minsi %1, %c0_i32 : i32
    %c0_i32_0 = arith.constant 0 : i32
    %c0_i32_1 = arith.constant 0 : i32
    return %2, %c0_i32_0 : i32, i32
  }
  func.func @transform_1(%arg0: i32, %arg1: i32) -> (i32, i32) {
    %c1_i32 = arith.constant 1 : i32
    %0 = arith.muli %arg0, %c1_i32 : i32
    %1 = arith.addi %0, %arg1 : i32
    %c0_i32 = arith.constant 0 : i32
    %2 = arith.minsi %1, %c0_i32 : i32
    %c0_i32_0 = arith.constant 0 : i32
    %c0_i32_1 = arith.constant 0 : i32
    return %2, %c0_i32_0 : i32, i32
  }
  func.func @transform_2(%arg0: i32, %arg1: i32) -> (i32, i32) {
    %c1_i32 = arith.constant 1 : i32
    %0 = arith.muli %arg0, %c1_i32 : i32
    %1 = arith.addi %0, %arg1 : i32
    %c0_i32 = arith.constant 0 : i32
    %2 = arith.minsi %1, %c0_i32 : i32
    %c0_i32_0 = arith.constant 0 : i32
    %c0_i32_1 = arith.constant 0 : i32
    return %2, %c0_i32_0 : i32, i32
  }
  func.func @transform_3(%arg0: i32, %arg1: i32) -> (i32, i32) {
    %c0_i32 = arith.constant 0 : i32
    %c0_i32_0 = arith.constant 0 : i32
    return %arg0, %c0_i32 : i32, i32
  }
}

</mosaic_0001>

<bundles_post_ra>
// kernel: tpu_custom_call.1
= control target key start
LH: loop header
LB: loop body
LE: loop exit
PB: predicated region body
PF: predicated region fallthrough
CT: control target
= control target key end

     0   :  { %vm111_vm0 = vcmask 130048   ;;  %s283_s0 = inlined_call_operand.vmem [shape: f32[8,16], index: 0, kind: input, shape index: {}]   ;;  %s284_s1 = inlined_call_operand.vmem [shape: s32[8,1], index: 1, kind: input, shape index: {}]   ;;  %s285_s2 = inlined_call_operand.vmem [shape: f32[8,1], index: 2, kind: input, shape index: {}]   ;;  %s286_s3 = inlined_call_operand.hbm [shape: f32[8,128], index: 3, kind: output, shape index: {}]  }
   0x1   :  { %v102_v0 = vld [vmem:[%s283_s0] sm:$0xff] }
   0x2   :  { %8 = vsyncpa [#allocation4], 0  ;;  %v112_v1 = vsel %vm111_vm0, %v102_v0, -inf  ;;  %v245_v2 = vmov 0   ;;  %v103_v3 = vld [vmem:[%s284_s1] sm:$0xff]  ;;  %v105_v9 = vlaneseq  ;;  %vm145_vm2 = vcmask 7168  }
   0x3   :  { %210 = vset.pattern.permute.xlu0 %v245_v2  ;;  %211 = vset.pattern.permute.xlu2 %v245_v2  ;;  %v104_v21 = vld [vmem:[%s285_s2] sm:$0xff]  ;;  %vm100_vm3 = vcmask 0   ;;  %v246_v29 = vmov 0.0   ;;  %s247_s16 = smov [#allocation3]   ;;  %s178_s20 = sshll.u32 %s286_s3, 4  ;;  %s179_s20 = int_to_ptr.hbm [resolvable:$true] %s178_s20 }
   0x4   :  { %113 = vmax.xlane.f32.xlu0 %v112_v1  ;;  %v106_v10 = vand.u32 127, %v105_v9  ;;  %v133_v24 = vsub.f32 0.0, %v104_v21  ;;  %101 = vst.msk [vmem:[#allocation2] sm:$0x1] %vm100_vm3, %v246_v29  ;;  %s176_s17 = sshll.u32 %s247_s16, 4  ;;  %s177_s17 = int_to_ptr.vmem [resolvable:$true] %s176_s17 }
   0xb   :  { %v144_v37 = vld [vmem:[#allocation2] sm:$0x1] }
  0x18   :  { %108 = vperm.xlu0 %210, %v103_v3  }
  0x77   :  { %v114_v4 = vpop.xlane.xlu0 %113 }
  0x78   :  { %v115_v5 = vsub.f32 %v102_v0, %v114_v4 }
  0x7a   :  { %v116_v6 = vmul.f32 1.442695, %v115_v5 }
  0x7c   :  { %213 = vpow2.f32 %v116_v6 }
  0x82   :  { %v214_v7 = vpop.eup %213 }
  0x83   :  { %v118_v8 = vsel %vm111_vm0, %v214_v7, 0.0 }
  0x84   :  { %119 = vadd.xlane.f32.xlu1 %v118_v8 }
  0x8a   :  { %v109_v11 = vpop.permute.xlu0 %108 }
  0x8b   :  { %vm110_vm1 = vcmp.eq.s32.totalorder %v106_v10, %v109_v11 }
  0x8c   :  { %v121_v12 = vsel %vm110_vm1, %v102_v0, 0.0 }
  0x8d   :  { %v122_v13 = vsel %vm111_vm0, %v121_v12, 0.0 }
  0x8e   :  { %123 = vadd.xlane.f32.xlu1 %v122_v13 }
  0xf7   :  { %v120_v14 = vpop.xlane.xlu1 %119 }
  0xf8   :  { %215 = vlog2.f32 %v120_v14 }
  0xfe   :  { %v216_v15 = vpop.eup %215 }
  0xff   :  { %v127_v17 = vmul.f32 0.6931472, %v216_v15 }
 0x101   :  { %v124_v16 = vpop.xlane.xlu1 %123 }
 0x102   :  { %v125_v18 = vsub.f32 %v124_v16, %v114_v4 }
 0x104   :  { %v128_v19 = vsub.f32 %v125_v18, %v127_v17 }
 0x106   :  { %v129_v20 = vmul.f32 1.442695, %v128_v19 }
 0x108   :  { %217 = vpow2.f32 %v129_v20 }
 0x10e   :  { %v218_v22 = vpop.eup %217 }
 0x10f   :  { %v131_v23 = vsub.f32 1.0, %v218_v22 }
 0x111   :  { %v132_v25 = vmul.f32 %v131_v23, %v131_v23 }
 0x113   :  { %v134_v26 = vmul.f32 %v133_v24, %v132_v25 }
 0x115   :  { %v135_v27 = vmul.f32 %v134_v26, %v128_v19 }
 0x117   :  { %v146_v28 = vsel %vm145_vm2, %v135_v27, 0.0 }
 0x118   :  { %147 = vadd.xlane.f32.xlu2 %v146_v28 }
 0x18b   :  { %v148_v30 = vpop.xlane.xlu2 %147 }
 0x18c   :  { %v149_v31 = vrot.slane %v148_v30, 4 }
 0x18e   :  { %v150_v32 = vadd.f32 %v149_v31, %v148_v30 }
 0x190   :  { %v151_v33 = vrot.slane %v150_v32, 2 }
 0x192   :  { %v152_v34 = vadd.f32 %v151_v33, %v150_v32 }
 0x194   :  { %v153_v35 = vrot.slane %v152_v34, 1 }
 0x196   :  { %v154_v36 = vadd.f32 %v153_v35, %v152_v34 }
 0x198   :  { %205 = vpush %v154_v36 }
 0x1c9   :  { %s206_s2 = spop %205 }
 0x1ca   :  { %v156_v38 = vstv %s206_s2 }
 0x1cb   :  { %v157_v39 = vadd.f32 %v156_v38, %v144_v37 }
 0x1cd   :  { %159 = vst.msk [vmem:[#allocation2] sm:$0x1] %vm100_vm3, %v157_v39 }
 0x1d4   :  { %v212_v40 = vld [vmem:[#allocation2] ss:$0 sm:$0xff] }
 0x1d5   :  { %167 = vperm.xlu2 %211, %v212_v40  }
 0x22f   :  { %v168_v41 = vpop.permute.xlu2 %167 }
 0x230   :  { %170 = vst [vmem:[#allocation3] sm:$0xff] %v168_v41 }
 0x231   :  { %181 = dma.vmem_to_hbm [thread:$0]  %s177_s17, 128, %s179_s20, [#allocation4]  }
 0x232   :  { %243 = dma.done.wait [#allocation4], 128  }
 0x233   :  { %244 = vsyncadd [#allocation4], 4294967168 }
 0x234   :  { %186 = vsyncpa [#allocation4], 1 }

</bundles_post_ra>
